<compile_context>
chip_gen: v7x
topology: tpu7x:2x2x1
jax: 0.10.0
libtpu: 0.0.40
codegen_flags: <defaults>
</compile_context>

<pallas_src>
from itertools import permutations

import numpy as np
import jax
import jax.numpy as jnp
from jax import lax
from jax.experimental import pallas as pl
from jax.experimental.pallas import tpu as pltpu


def _round_up(x, m):
    return ((x + m - 1) // m) * m


def _cdiv(a, b):
    return (a + b - 1) // b


def _gram_kernel(x_ref, out_ref):
    """Single stacked self-Gram per tile, accumulated in the resident f32 output.

    x_ref   : (R, t_tile) native dtype; R = bb * 2 * S rows = bb batch items of
              [targets; preds] sources on sublanes, time on lanes.
    out_ref : (R, R) f32 output block, resident across the T reduction axis.
    """
    @pl.when(pl.program_id(2) == 0)
    def _init():
        out_ref[...] = jnp.zeros_like(out_ref)

    x = x_ref[...]
    # One MXU Gram per grid step (contracts the lane/time axis, f32 accumulate).
    # TODO(synk): if a bundle dump shows the XLU transpose of the 'jt' operand
    # competing with vmatmul on the vector-extended slot, feed a pre-transposed
    # copy of the tile as a second input instead.
    out_ref[...] += jnp.einsum('it,jt->ij', x, x,
                               preferred_element_type=jnp.float32)


def pairwise_loss_mat(preds, targets, *, t_tile=None, bb=None):
    """(B, T, S) x2 -> (B, S, S) f32 pairwise MSE matrix (mean over time).

    out[b, i, j] = mean_t (preds[b, t, j] - targets[b, t, i])**2
    """
    B, T, S = preds.shape
    dtype = preds.dtype
    itemsize = jnp.dtype(dtype).itemsize
    sub_tile = max(8, 32 // itemsize)          # sublane tile: 8 f32 / 16 bf16 / 32 i8

    if bb is None:
        bb = min(B, 8)
    bb = max(1, min(bb, B))
    n_b = _cdiv(B, bb)
    b_pad = n_b * bb
    R = bb * 2 * S                             # stacked rows per grid step

    # Split the T reduction across both TensorCores (v7x) when the batch grid
    # axis alone cannot shard the work.
    n_split = 2 if (n_b == 1 and _round_up(T, 128) >= 256) else 1

    if t_tile is None:
        # ~4 MiB per input block (dtype-aware sublane padding); 2 pipeline buffers
        # stay far under scoped-VMEM limits on v5e/v6e/v7x.
        budget = 4 * 1024 * 1024
        rows_pad = _round_up(R, sub_tile)
        max_t = max(128, (budget // (rows_pad * itemsize)) // 128 * 128)
        n_t_total = max(1, _cdiv(T, max_t))
    else:
        t_tile = min(_round_up(t_tile, 128), _round_up(T, 128))
        n_t_total = max(1, _cdiv(T, t_tile))

    if n_split > 1:
        n_t_total = _round_up(n_t_total, n_split)
    if t_tile is None:
        # Balanced tiles: no mostly-zero trailing tile.
        t_tile = _round_up(_cdiv(T, n_t_total), 128)
    t_pad = n_t_total * t_tile
    n_t_inner = n_t_total // n_split

    # One fused producer: transpose (sources -> sublanes, time -> lanes), stack
    # targets above preds, zero-pad batch/time, flatten bb batch items per slab.
    # Zero padding contributes nothing to any Gram term.
    x = jnp.concatenate(
        [jnp.swapaxes(targets, -1, -2), jnp.swapaxes(preds, -1, -2)], axis=1)
    x = jnp.pad(x, ((0, b_pad - B), (0, 0), (0, t_pad - T)))
    x = x.reshape(n_b, R, t_pad)               # free row-major reshape

    gram = pl.pallas_call(
        _gram_kernel,
        out_shape=jax.ShapeDtypeStruct((n_split, n_b, R, R), jnp.float32),
        grid_spec=pltpu.PrefetchScalarGridSpec(
            num_scalar_prefetch=0,
            grid=(n_split, n_b, n_t_inner),
            in_specs=[
                pl.BlockSpec((None, R, t_tile),
                             lambda s, b, k: (b, 0, s * n_t_inner + k)),
            ],
            out_specs=pl.BlockSpec((None, None, R, R),
                                   lambda s, b, k: (s, b, 0, 0)),
        ),
        compiler_params=pltpu.CompilerParams(
            dimension_semantics=("parallel", "parallel", "arbitrary"),
            vmem_limit_bytes=32 * 1024 * 1024,
        ),
    )(x)

    # Tiny post-processing (<< kernel cost): combine T splits, pull the per-batch
    # (2S, 2S) diagonal blocks, and form the pairwise loss matrix.
    gram = gram.sum(axis=0)                                    # (n_b, R, R)
    gram = gram.reshape(n_b, bb, 2 * S, bb, 2 * S)
    gram = jnp.diagonal(gram, axis1=1, axis2=3)                # (n_b, 2S, 2S, bb)
    gram = jnp.moveaxis(gram, -1, 1).reshape(b_pad, 2 * S, 2 * S)[:B]

    tt = gram[:, :S, :S]                                       # targ_i . targ_j
    pp = gram[:, S:, S:]                                       # pred_i . pred_j
    tp = gram[:, :S, S:]                                       # targ_i . pred_j
    t_sq = jnp.diagonal(tt, axis1=1, axis2=2)                  # (B, S) ||targ_i||^2
    p_sq = jnp.diagonal(pp, axis1=1, axis2=2)                  # (B, S) ||pred_j||^2
    inv_t = np.float32(1.0 / T)
    # TODO(synk): the Gram expansion cancels when preds ~= targets (tiny losses);
    # an exact-diff variant would need a direct (p - t)^2 elementwise kernel.
    loss_mat = inv_t * (t_sq[:, :, None] + p_sq[:, None, :] - 2.0 * tp)
    return loss_mat


def pit_wrapper_forward(preds, targets, weights=None, *, t_tile=None, bb=None):
    """JAX/Pallas equivalent of PitWrapper.forward with elementwise-MSE base loss.

    preds / targets: (B, T, S), sources on the last axis (PyTorch convention).
    Returns (loss, perms):
      loss  : (B,) float32  — per-batch-item optimal-assignment loss
      perms : (B, S) int32  — pred source index assigned to each target source
                              (same as the PyTorch list of permutation tuples).
    """
    del weights  # the elementwise-MSE base loss ignores it (weights=None path)
    B, T, S = preds.shape
    loss_mat = pairwise_loss_mat(preds, targets, t_tile=t_tile, bb=bb)  # (B, S, S)

    # Enumerate all S! permutations in itertools order (same order as the torch
    # loop, so first-minimum tie-breaking via argmin matches exactly).
    all_perms = jnp.asarray(list(permutations(range(S))), dtype=jnp.int32)  # (P, S)
    rows = jnp.arange(S, dtype=jnp.int32)
    gathered = loss_mat[:, rows[None, :], all_perms]        # (B, P, S)
    perm_losses = gathered.mean(axis=-1)                    # (B, P)
    best = jnp.argmin(perm_losses, axis=-1)                 # (B,)
    loss = jnp.take_along_axis(perm_losses, best[:, None], axis=-1)[:, 0]
    best_perms = all_perms[best]                            # (B, S)
    return loss, best_perms


pit_wrapper_forward_jit = jax.jit(pit_wrapper_forward, static_argnames=("t_tile", "bb"))


def _reference_numpy(preds, targets):
    """Direct transcription of the PyTorch PitWrapper with elementwise-MSE base loss."""
    preds = np.asarray(preds, dtype=np.float64)
    targets = np.asarray(targets, dtype=np.float64)
    B, T, S = preds.shape
    losses, plist = [], []
    for b in range(B):
        # loss_mat[i, j] = mean_t (pred[t, j] - targ[t, i])^2
        lm = np.mean((preds[b][:, None, :] - targets[b][:, :, None]) ** 2, axis=0)
        best_l, best_p = None, None
        for p in permutations(range(S)):
            c = lm[np.arange(S), list(p)].mean()
            if best_l is None or best_l > c:
                best_l, best_p = c, p
        losses.append(best_l)
        plist.append(best_p)
    return np.asarray(losses, dtype=np.float32), np.asarray(plist, dtype=np.int32)


if __name__ == "__main__":
    key = jax.random.PRNGKey(0)
    B, T, S = 3, 200, 3            # batch items, time samples, sources
    k1, k2 = jax.random.split(key)
    preds = jax.random.normal(k1, (B, T, S), dtype=jnp.float32)
    targets = jax.random.normal(k2, (B, T, S), dtype=jnp.float32)

    ref_loss, ref_perms = _reference_numpy(preds, targets)

    # Case 1: default tiling; n_b == 1 here so the 2-way "parallel" T-split path
    # (v7x dual TensorCore) is exercised.
    loss, perms_out = jax.block_until_ready(pit_wrapper_forward_jit(preds, targets))
    assert np.allclose(np.asarray(loss), ref_loss, rtol=1e-4, atol=1e-5), (loss, ref_loss)
    assert np.array_equal(np.asarray(perms_out), ref_perms), (perms_out, ref_perms)

    # Case 2: forced small T tile + batch block that does not divide B
    # (exercises init/accumulate/finalize over the T grid axis and zero padding
    # of both the batch and time axes, n_split == 1 path).
    loss2, perms2 = jax.block_until_ready(
        pit_wrapper_forward_jit(preds, targets, t_tile=128, bb=2))
    assert np.allclose(np.asarray(loss2), ref_loss, rtol=1e-4, atol=1e-5), (loss2, ref_loss)
    assert np.array_equal(np.asarray(perms2), ref_perms), (perms2, ref_perms)

    # Case 3: native bf16 inputs (no f32 materialisation outside the kernel;
    # MXU consumes bf16 with f32 accumulation).
    preds_bf = preds.astype(jnp.bfloat16)
    targs_bf = targets.astype(jnp.bfloat16)
    ref_loss_bf, ref_perms_bf = _reference_numpy(
        np.asarray(preds_bf.astype(jnp.float32)),
        np.asarray(targs_bf.astype(jnp.float32)))
    loss3, perms3 = jax.block_until_ready(pit_wrapper_forward_jit(preds_bf, targs_bf))
    assert np.allclose(np.asarray(loss3), ref_loss_bf, rtol=5e-3, atol=5e-3), (loss3, ref_loss_bf)
    assert np.array_equal(np.asarray(perms3), ref_perms_bf), (perms3, ref_perms_bf)

    print("KERNEL_OK")
</pallas_src>

<mosaic_0001>
module attributes {stable_mosaic.version = 11 : i64} {
  func.func @_gram_kernel(%arg0: i32, %arg1: i32, %arg2: i32, %arg3: memref<1x18x128xf32, #tpu.memory_space<vmem>>, %arg4: memref<1x1x18x18xf32, #tpu.memory_space<vmem>>) attributes {dimension_semantics = [#tpu.dimension_semantics<parallel>, #tpu.dimension_semantics<parallel>, #tpu.dimension_semantics<arbitrary>], iteration_bounds = array<i64: 2, 1, 1>, scalar_prefetch = 0 : i64, scratch_operands = 0 : i64, tpu.core_type = #tpu.core_type<tc>, window_params = [{transform_indices = @transform_0, window_bounds = array<i64: 1, 18, 128>}, {transform_indices = @transform_1, window_bounds = array<i64: 1, 1, 18, 18>}]} {
    %c0_i32 = arith.constant 0 : i32
    %0 = arith.cmpi eq, %arg2, %c0_i32 : i32
    %1 = arith.extui %0 : i1 to i32
    %c0_i32_0 = arith.constant 0 : i32
    %2 = arith.cmpi ne, %1, %c0_i32_0 : i32
    scf.if %2 {
      %cst_11 = arith.constant 0.000000e+00 : f32
      %12 = vector.broadcast %cst_11 : f32 to vector<18x18xf32>
      %c0_12 = arith.constant 0 : index
      %c0_13 = arith.constant 0 : index
      %c0_14 = arith.constant 0 : index
      %c0_15 = arith.constant 0 : index
      %13 = vector.load %arg4[%c0_12, %c0_13, %c0_14, %c0_15] : memref<1x1x18x18xf32, #tpu.memory_space<vmem>>, vector<1x1x18x18xf32>
      %14 = vector.shape_cast %13 : vector<1x1x18x18xf32> to vector<18x18xf32>
      %15 = vector.shape_cast %12 : vector<18x18xf32> to vector<1x1x18x18xf32>
      tpu.vector_store %arg4[%c0_12, %c0_13, %c0_14, %c0_15], %15 {strides = array<i32>} : memref<1x1x18x18xf32, #tpu.memory_space<vmem>>, vector<1x1x18x18xf32>,
    } else {
    }
    %c0 = arith.constant 0 : index
    %c0_1 = arith.constant 0 : index
    %c0_2 = arith.constant 0 : index
    %3 = vector.load %arg3[%c0, %c0_1, %c0_2] : memref<1x18x128xf32, #tpu.memory_space<vmem>>, vector<1x18x128xf32>
    %4 = vector.shape_cast %3 : vector<1x18x128xf32> to vector<18x128xf32>
    %c0_3 = arith.constant 0 : index
    %c0_4 = arith.constant 0 : index
    %c0_5 = arith.constant 0 : index
    %c0_6 = arith.constant 0 : index
    %5 = vector.load %arg4[%c0_3, %c0_4, %c0_5, %c0_6] : memref<1x1x18x18xf32, #tpu.memory_space<vmem>>, vector<1x1x18x18xf32>
    %6 = vector.shape_cast %5 : vector<1x1x18x18xf32> to vector<18x18xf32>
    "tpu.trace_start"() <{level = 10 : i32, message = "it,jt->ij"}> : () -> ()
    %cst = arith.constant dense<0.000000e+00> : vector<18x18xf32>
    %7 = tpu.matmul %4, %4, %cst {dimension_numbers = #tpu.dot_dimension_numbers<[1], [1], [0], [0], [0, 0, 1, 0], [], []>} : vector<18x128xf32>, vector<18x128xf32>, vector<18x18xf32> -> vector<18x18xf32>
    "tpu.trace_stop"() : () -> ()
    %8 = arith.addf %6, %7 : vector<18x18xf32>
    %c0_7 = arith.constant 0 : index
    %c0_8 = arith.constant 0 : index
    %c0_9 = arith.constant 0 : index
    %c0_10 = arith.constant 0 : index
    %9 = vector.load %arg4[%c0_7, %c0_8, %c0_9, %c0_10] : memref<1x1x18x18xf32, #tpu.memory_space<vmem>>, vector<1x1x18x18xf32>
    %10 = vector.shape_cast %9 : vector<1x1x18x18xf32> to vector<18x18xf32>
    %11 = vector.shape_cast %8 : vector<18x18xf32> to vector<1x1x18x18xf32>
    tpu.vector_store %arg4[%c0_7, %c0_8, %c0_9, %c0_10], %11 {strides = array<i32>} : memref<1x1x18x18xf32, #tpu.memory_space<vmem>>, vector<1x1x18x18xf32>,
    return
  }
  func.func @transform_0(%arg0: i32, %arg1: i32, %arg2: i32) -> (i32, i32, i32) {
    %c1_i32 = arith.constant 1 : i32
    %0 = arith.muli %arg0, %c1_i32 : i32
    %1 = arith.addi %0, %arg2 : i32
    %c0_i32 = arith.constant 0 : i32
    %c0_i32_0 = arith.constant 0 : i32
    return %arg1, %c0_i32, %1 : i32, i32, i32
  }
  func.func @transform_1(%arg0: i32, %arg1: i32, %arg2: i32) -> (i32, i32, i32, i32) {
    %c0_i32 = arith.constant 0 : i32
    %c0_i32_0 = arith.constant 0 : i32
    %c0_i32_1 = arith.constant 0 : i32
    return %arg0, %arg1, %c0_i32, %c0_i32_0 : i32, i32, i32, i32
  }
}

</mosaic_0001>

<bundles_post_ra>
// kernel: pit_wrapper_forward.1
= control target key start
LH: loop header
LB: loop body
LE: loop exit
PB: predicated region body
PF: predicated region fallthrough
CT: control target
= control target key end

     0   :  { %s530_s6 = smov 0   ;;  %s532_s7 = smov 0   ;;  %s605_s0 = inlined_call_operand.vmem [shape: f32[1,18,256], index: 0, kind: input, shape index: {}]   ;;  %s606_s1 = inlined_call_operand.vmem [shape: f32[2,1,18,18], index: 1, kind: output, shape index: {}]  }
   0x1   :  { %s534_s8 = smov 0   ;;  %s536_s9 = smov 0  }
   0x2   :  { %s538_s10 = smov 0  }
   0x3 LB: > { %s30_s11 = sadd.s32 1, %s511_s9  ;;  %p48_p1 = scmp.ne.s32.totalorder %s503_s7, %s499_s6  ;;  %s515_s10 = sphi %s538_s10, %s11_s10   ;;  %s511_s9 = sphi %s536_s9, %s610_s9   ;;  %s507_s8 = sphi %s534_s8, %s609_s8   ;;  %s503_s7 = sphi %s532_s7, %s608_s7   ;;  %s499_s6 = sphi %s530_s6, %s607_s6  }
   0x4   : > { %p32_p0 = scmp.ge.s32.totalorder %s30_s11, 2  ;;  %p49_p2 = scmp.eq.s32.totalorder %s515_s10, 0 }
   0x5   : > { %s41_s13 = sadd.s32 1, %s503_s7  ;;  %p397_p5 = scmp.ge.s32.totalorder %s515_s10, 2 }
   0x6   : > { %s612_s11 = smov (%p32_p0, %s30_s11), 0  ;;  %p50_p3 = por %p49_p2, %p48_p1 }
   0x7   : > { %s37_s12 = ssub.s32 %s511_s9, %s612_s11  ;;  %102 = sbr.rel (%p397_p5) target bundleno = 21 (0x15), region = 16 }
   0x8   : > { %p39_p4 = scmp.eq.s32.totalorder %s37_s12, 0 }
   0xa   : > { %s565_s14 = scalar_select %p39_p4, %s503_s7, %s41_s13  }
   0xe   : > { %105 = sbr.rel (!%p50_p3) target bundleno = 21 (0x15), region = 20  ;;  %s107_s15 = sand.u32 (%p50_p3), 1, %s503_s7  }
   0xf   : > { %s398_s16 = sshll.u32 (%p50_p3), %s511_s9, 3  ;;  %s431_s17 = smul.u32 (%p50_p3), 24, %s107_s15 }
  0x10   : > { %s114_s20 = scalar_lea.vmem (%p50_p3), %s605_s0, %s398_s16 }
  0x11   : > { %v146_v0 = vld [vmem:[%s114_s20] sm:$0xff] (%p50_p3)  ;;  %v148_v1 = vld [vmem:[%s114_s20 + $0x10] sm:$0xff] (%p50_p3)  ;;  %s109_s21 = scalar_lea.vmem (%p50_p3), [#allocation2], %s431_s17 }
  0x12   : > { %v150_v2 = vld [vmem:[%s114_s20 + $0x20] sm:$0xff] (%p50_p3)  ;;  %147 = vst [vmem:[%s109_s21] sm:$0xff] (%p50_p3), %v146_v0  ;;  %149 = vst [vmem:[%s109_s21 + $0x8] sm:$0xff] (%p50_p3), %v148_v1 }
  0x13   : > { %151 = vst [vmem:[%s109_s21 + $0x10] sm:$0xff] (%p50_p3), %v150_v2 }
  0x15 PF: > { %p399_p6 = scmp.ge.s32.totalorder %s515_s10, 1  ;;  %p156_p7 = scmp.lt.s32.totalorder %s515_s10, 3 }
  0x17   : > { %p157_p8 = pnand %p399_p6, %p156_p7 }
  0x18   : > { %s163_s22 = sand.u32 (!%p157_p8), 1, %s499_s6   ;;  %p187_p9 = scmp.lt.s32.totalorder (!%p157_p8), %s507_s8, 1  ;;  %v517_v3 = vmov (!%p157_p8), 0.0|0.0   ;;  %vm518_vm0 = vmmov (!%p157_p8), 0   ;;  %v519_v4 = vmov (!%p157_p8), 0.0   ;;  %vm200_vm1 = vcmask (!%p157_p8), 146432  }
  0x19   : > { %160 = sbr.rel (%p157_p8) target bundleno = 262 (0x106), region = 58  ;;  %427 = vmatprep.subr.bf16.mxu1 (!%p157_p8), %v517_v3  ;;  %424 = vmatprep.subr.bf16.mxu0 (!%p157_p8), %v517_v3  ;;  %vm203_vm2 = vcmask (!%p157_p8), 140288  }
  0x1a   : > { %s432_s23 = smul.u32 (!%p157_p8), 24, %s163_s22  ;;  %418 = vmatprep.mubr.msk.f32.mxu1 (!%p157_p8), %vm518_vm0, %v519_v4  ;;  %415 = vmatprep.mubr.msk.f32.mxu0 (!%p157_p8), %vm518_vm0, %v519_v4 }
  0x1c   : > { %s165_s24 = scalar_lea.vmem (!%p157_p8), [#allocation2], %s432_s23 }
  0x1d   : > { %v205_v5 = vld [vmem:[%s165_s24] sm:$0xff] (!%p157_p8)  ;;  %v206_v6 = vld [vmem:[%s165_s24 + $0x8] sm:$0xff] (!%p157_p8)  ;;  %v207_v8 = vld [vmem:[%s165_s24 + $0x10] sm:$0x3] (!%p157_p8) }
  0x1e   : > { %v425_v7 = vpack.c.bf16 (!%p157_p8), %v206_v6, %v205_v5 }
  0x20   : > { %s614_s8 = smov (!%p187_p9, %s507_s8), 1  ;;  %429 = vmatpush3.bf16.xpose.msra.mxu1 %v425_v7  ;;  %426 = vmatpush3.bf16.xpose.msra.mxu0 %v425_v7 }
  0x21   : > { %s433_s25 = smul.u32 24, %s614_s8  ;;  %428 = vmatprep.subr.mxu1 %v519_v4  ;;  %413 = vmatprep.subr.mxu0 %v519_v4 }
  0x23   : > { %s195_s28 = scalar_lea.vmem %s606_s1, %s433_s25 }
  0x24   : > { %202 = vst.msk [vmem:[%s195_s28 + $0x8] sm:$0xff] %vm200_vm1, %v519_v4  ;;  %201 = vst.msk [vmem:[%s195_s28] sm:$0xff] %vm200_vm1, %v519_v4 }
  0x25   : > { %204 = vst.msk [vmem:[%s195_s28 + $0x10] sm:$0x3] %vm203_vm2, %v519_v4 }
  0x28   : > { %430 = vmatpush3.xpose.msra.mxu1 %v207_v8  ;;  %414 = vmatpush3.xpose.msra.mxu0 %v207_v8 }
  0x2b   : > { %419 = vmatmul.mubr.f32.vlgmr.msra.gmra.mrb[0].mxu1 %v206_v6  ;;  %416 = vmatmul.mubr.f32.vlgmr.msra.gmra.mrb[0].mxu0 %v205_v5  ;;  %v209_v9 = vld [vmem:[%s195_s28 + $0x8] sm:$0xff]  ;;  %v208_v10 = vld [vmem:[%s195_s28] sm:$0xff] }
  0x2c   : > { %421 = vmatprep.mubr.msk.f32.mxu1 %vm518_vm0, %v519_v4  ;;  %v210_v17 = vld [vmem:[%s195_s28 + $0x10] sm:$0x3] }
  0x2f   : > { %422 = vmatmul.mubr.f32.gmra.mrb[2].mxu1 %v207_v8 }
  0xfe   : > { %v282_v11 = vpop.f32.mrb[0].mxu1  ;;  %v277_v12 = vpop.f32.mrb[0].mxu0 }
  0xff   : > { %v292_v13 = vadd.f32 %v282_v11, %v209_v9  ;;  %v420_v14 = vpop.f32.mrb[1].mxu1  ;;  %v291_v15 = vadd.f32 %v277_v12, %v208_v10  ;;  %v417_v16 = vpop.f32.mrb[1].mxu0 }
 0x101   : > { %296 = vst.msk [vmem:[%s195_s28 + $0x8] sm:$0xff] %vm200_vm1, %v292_v13  ;;  %295 = vst.msk [vmem:[%s195_s28] sm:$0xff] %vm200_vm1, %v291_v15 }
 0x102   : > { %v287_v18 = vpop.f32.mrb[2].mxu1 }
 0x103   : > { %v293_v19 = vadd.f32 %v287_v18, %v210_v17  ;;  %v423_v20 = vpop.f32.mrb[3].mxu1 }
 0x105   : > { %298 = vst.msk [vmem:[%s195_s28 + $0x10] sm:$0x3] %vm203_vm2, %v293_v19 }
 0x106 PF: > { %s11_s10 = sadd.s32 1, %s515_s10   ;;  %s607_s6 = smov %s503_s7 }
 0x107   : > { %p8_p10 = scmp.ge.s32.totalorder %s11_s10, 4   ;;  %s608_s7 = smov %s565_s14 }
 0x108   : > { %s609_s8 = smov %s511_s9  ;;  %s610_s9 = smov %s612_s11 }
 0x109   :  { %10 = sbr.rel (!%p8_p10) target bundleno = 3 (0x3), region = 101 }

</bundles_post_ra>
